<compile_context>
chip_gen: v7x
topology: tpu7x:2x2x1
jax: 0.10.0
libtpu: 0.0.40
codegen_flags: <defaults>
</compile_context>

<pallas_src>
import math

import jax
import jax.numpy as jnp
from jax.experimental import pallas as pl
from jax.experimental.pallas import tpu as pltpu

_LANE = 128
_MAX_COLS = 4096                 # cap lane-axis width of the 2D slab
_TINY_BYTES = 1 << 20            # below this, plain XLA beats a custom call
_SMALL_FALLBACK_BYTES = 2 << 20  # single whole-array block fallback threshold


def _relu(v):
    return jnp.maximum(v, 0)


def _make_act_kernel(act):
    def kernel(x_ref, o_ref):
        o_ref[...] = act(x_ref[...]).astype(o_ref.dtype)
    return kernel


def _round_up(a: int, b: int) -> int:
    return pl.cdiv(a, b) * b


def _sublane_multiple(dtype) -> int:
    # Native sublane packing: 8 for 32-bit, 16 for 16-bit, 32 for 8-bit dtypes.
    return {4: 8, 2: 16, 1: 32}.get(jnp.dtype(dtype).itemsize, 8)


def _tpu_params():
    """(block_bytes, vmem_limit_bytes_or_None, multi_tensorcore) per chip gen."""
    kind = ""
    try:
        kind = jax.devices()[0].device_kind.lower()
    except Exception:
        pass
    if "v6" in kind:                    # v6e: 1 TC, 128 MiB VMEM, ~1.4 TB/s HBM
        return 4 << 20, 48 << 20, False
    if "v7" in kind or "tpu7" in kind:  # v7x: 2 TC, 64 MiB VMEM, ~3.2 TB/s HBM
        return 6 << 20, 48 << 20, True
    if "v5p" in kind:                   # v5p: megacore (2 TC), 128 MiB VMEM
        return 4 << 20, 48 << 20, True
    if "v5" in kind:                    # v5e: 1 TC, 16 MiB scoped default
        return 2 << 20, None, False
    return 2 << 20, None, False         # unknown generation: conservative


def _aligned_factorization(total: int, sub: int):
    """(rows, cols): rows*cols == total, cols % 128 == 0, rows % sub == 0.

    Prefers wide cols (up to _MAX_COLS) so the output slab is lane dense.
    Returns None when no such factorization exists."""
    if total == 0 or total % (_LANE * sub) != 0:
        return None
    m = total // (_LANE * sub)
    c = 1
    for cand in range(_MAX_COLS // _LANE, 0, -1):   # at most 32 iterations
        if m % cand == 0:
            c = cand
            break
    cols = _LANE * c
    rows = total // cols
    return rows, cols


def _lane_dense_2d(total: int):
    """Small-fallback 2D shape: cols = largest 128-multiple divisor of total."""
    if total % _LANE == 0:
        m = total // _LANE
        for cand in range(min(_MAX_COLS // _LANE, m), 0, -1):
            if m % cand == 0:
                cols = _LANE * cand
                return total // cols, cols
    return 1, total


def _choose_tile_rows(rows: int, cols: int, itemsize: int, sub: int,
                      block_bytes: int, multi_tc: bool) -> int:
    row_bytes = cols * itemsize
    slab_bytes = rows * row_bytes
    tr = max(sub, (block_bytes // row_bytes) // sub * sub)
    if tr >= rows:
        # Whole slab fits one block.  On multi-TC parts split big slabs in two
        # so both TensorCores get work; on single-TC parts keep one block.
        if multi_tc and rows >= 2 * sub and slab_bytes > (4 << 20):
            return min(rows, _round_up(pl.cdiv(rows, 2), sub))
        return rows
    if multi_tc:
        g = pl.cdiv(rows, tr)
        if g % 2 == 1:
            # Shrink the tile (by sublane steps, at most 2x) until the grid is
            # actually even, so the two TensorCores stay balanced.
            t = tr
            while t > sub and pl.cdiv(rows, t) % 2 == 1:
                t -= sub
            if pl.cdiv(rows, t) % 2 == 0 and 2 * t >= tr:
                tr = t
    return tr


def _act_2d(x2: jax.Array, act, tile_rows: int, vmem_limit) -> jax.Array:
    rows, cols = x2.shape
    itemsize = jnp.dtype(x2.dtype).itemsize
    cp_kwargs = dict(dimension_semantics=("parallel",))
    if vmem_limit is not None:
        cp_kwargs["vmem_limit_bytes"] = int(vmem_limit)
    return pl.pallas_call(
        _make_act_kernel(act),
        out_shape=jax.ShapeDtypeStruct((rows, cols), x2.dtype),
        grid=(pl.cdiv(rows, tile_rows),),
        in_specs=[pl.BlockSpec((tile_rows, cols), lambda i: (i, 0))],
        out_specs=pl.BlockSpec((tile_rows, cols), lambda i: (i, 0)),
        compiler_params=pltpu.CompilerParams(**cp_kwargs),
        cost_estimate=pl.CostEstimate(
            flops=rows * cols,
            transcendentals=0,
            bytes_accessed=2 * rows * cols * itemsize),
    )(x2)


def act_layer(x: jax.Array, act=_relu, *, force_pallas: bool = False) -> jax.Array:
    """ActLayer.forward: apply the elementwise `act` via a Pallas TPU kernel."""
    shape, dtype = x.shape, x.dtype
    total = int(math.prod(shape)) if shape else 1
    itemsize = jnp.dtype(dtype).itemsize
    sub = _sublane_multiple(dtype)
    nbytes = total * itemsize

    if total == 0:
        return act(x)

    # Tiny inputs: a custom call costs microseconds of dispatch while the HBM
    # traffic is nanoseconds -- let XLA fuse it (unless explicitly forced).
    if not force_pallas and nbytes <= _TINY_BYTES:
        return act(x)

    block_bytes, vmem_limit, multi_tc = _tpu_params()

    fact = _aligned_factorization(total, sub)
    if fact is not None:
        # Aligned hot path: no padding, no slicing, lane-dense slab.
        rows, cols = fact
        tr = _choose_tile_rows(rows, cols, itemsize, sub, block_bytes, multi_tc)
        out2 = _act_2d(x.reshape(rows, cols), act, tr, vmem_limit)
        return out2.reshape(shape)

    # ---- Fallbacks for totals not divisible by sub*128 ---------------------
    if nbytes <= _SMALL_FALLBACK_BYTES:
        # Single whole-array block (block dims == array dims is always legal),
        # reshaped to be as lane-dense as possible (cols >= 128 when feasible).
        r, c = _lane_dense_2d(total)
        return _act_2d(x.reshape(r, c), act, r, vmem_limit).reshape(shape)

    # Large unaligned input (rare): plain XLA elementwise is exactly one HBM
    # read + one write (the old pad+slice path cost ~3x traffic).
    # TODO(synk): could split into an aligned Pallas prefix + tiny XLA tail if
    # a single fused pass ever proves insufficient.
    return act(x)


# ----------------------------- reference + main ---------------------------- #

def _act_ref(x):
    return jnp.maximum(x, 0)


if __name__ == "__main__":
    key = jax.random.PRNGKey(0)
    # Small NCHW input consistent with the module's forward.
    x = jax.random.normal(key, (2, 4, 16, 16), dtype=jnp.float32)
    y_ref = _act_ref(x)

    # Exercise the Pallas kernel on the module's test shape (aligned path).
    y = jax.block_until_ready(act_layer(x, force_pallas=True))
    assert y.shape == x.shape and y.dtype == x.dtype
    assert jnp.array_equal(y, y_ref), "mismatch vs reference (aligned path)"

    # Default routing: tiny input takes the fused XLA fast path.
    y2 = jax.block_until_ready(act_layer(x))
    assert jnp.array_equal(y2, y_ref), "mismatch vs reference (tiny path)"

    # Unaligned small shape exercises the lane-dense single-block fallback.
    x3 = jax.random.normal(key, (3, 5, 128), dtype=jnp.float32)
    y3 = jax.block_until_ready(act_layer(x3, force_pallas=True))
    assert jnp.array_equal(y3, _act_ref(x3)), "mismatch vs reference (fallback)"

    print("KERNEL_OK")
</pallas_src>

<mosaic_0001>
module attributes {stable_mosaic.version = 11 : i64} {
  func.func @kernel(%arg0: i32, %arg1: memref<8x256xf32, #tpu.memory_space<vmem>>, %arg2: memref<8x256xf32, #tpu.memory_space<vmem>>) attributes {dimension_semantics = [#tpu.dimension_semantics<parallel>], iteration_bounds = array<i64: 1>, scalar_prefetch = 0 : i64, scratch_operands = 0 : i64, tpu.core_type = #tpu.core_type<tc>, window_params = [{transform_indices = @transform_0, window_bounds = array<i64: 8, 256>}, {transform_indices = @transform_1, window_bounds = array<i64: 8, 256>}]} {
    %c0 = arith.constant 0 : index
    %c0_0 = arith.constant 0 : index
    %0 = vector.load %arg1[%c0, %c0_0] : memref<8x256xf32, #tpu.memory_space<vmem>>, vector<8x256xf32>
    %cst = arith.constant 0.000000e+00 : f32
    %1 = vector.broadcast %cst : f32 to vector<8x256xf32>
    %2 = arith.maximumf %0, %1 : vector<8x256xf32>
    %c0_1 = arith.constant 0 : index
    %c0_2 = arith.constant 0 : index
    %3 = vector.load %arg2[%c0_1, %c0_2] : memref<8x256xf32, #tpu.memory_space<vmem>>, vector<8x256xf32>
    tpu.vector_store %arg2[%c0_1, %c0_2], %2 {strides = array<i32>} : memref<8x256xf32, #tpu.memory_space<vmem>>, vector<8x256xf32>,
    return
  }
  func.func @transform_0(%arg0: i32) -> (i32, i32) {
    %c0_i32 = arith.constant 0 : i32
    %c0_i32_0 = arith.constant 0 : i32
    return %arg0, %c0_i32 : i32, i32
  }
  func.func @transform_1(%arg0: i32) -> (i32, i32) {
    %c0_i32 = arith.constant 0 : i32
    %c0_i32_0 = arith.constant 0 : i32
    return %arg0, %c0_i32 : i32, i32
  }
}

</mosaic_0001>

<bundles_post_ra>
// kernel: tpu_custom_call.1
= control target key start
LH: loop header
LB: loop body
LE: loop exit
PB: predicated region body
PF: predicated region fallthrough
CT: control target
= control target key end

     0   :  { %6 = vsyncpa [#allocation3], 0  ;;  %s128_s0 = inlined_call_operand.hbm [shape: f32[8,256], index: 0, kind: input, shape index: {}]   ;;  %s129_s1 = inlined_call_operand.hbm [shape: f32[8,256], index: 1, kind: output, shape index: {}]  }
   0x1   :  { %7 = vsyncpa [#allocation4], 0  ;;  %s92_s6 = smov [#allocation2]   ;;  %s44_s10 = scalar_lea.hbm %s128_s0, 256 }
   0x2   :  { %s14_s7 = sshll.u32 %s92_s6, 4  ;;  %p45_p0 = scmp.ne.s32.totalorder %s128_s0, %s44_s10  ;;  %s15_s7 = int_to_ptr.vmem [resolvable:$true] %s14_s7 }
   0x3   :  { %p48_p1 = scmp.lt.u32.totalorder %s44_s10, %s128_s0 }
   0x5   :  { %p50_p2 = pnand %p48_p1, %p45_p0 }
   0x7   :  { %53 = shalt.err (!%p50_p2)
}
   0x8   :  { %s54_s15 = scalar_lea.vmem %s15_s7, 256  ;;  %p59_p4 = scmp.lt.s32.totalorder %s15_s7, %s15_s7 }
   0x9   :  { %p55_p3 = scmp.ne.s32.totalorder %s15_s7, %s54_s15  ;;  %p60_p5 = scmp.lt.s32.totalorder %s54_s15, %s54_s15 }
   0xb   :  { %p61_p6 = por %p60_p5, %p59_p4 }
   0xd   :  { %p62_p7 = pnand %p61_p6, %p55_p3 }
   0xf   :  { %65 = shalt.err (!%p62_p7)
}
  0x10   :  { %17 = dma.hbm_to_vmem [thread:$0]  %s128_s0, 256, %s15_s7, [#allocation3]  }
  0x11   :  { %88 = dma.done.wait [#allocation3], 256  }
  0x12   :  { %89 = vsyncadd [#allocation3], 4294967040  ;;  %s93_s18 = smov [#allocation5]   ;;  %v21_v0 = vld [vmem:[#allocation2] sm:$0xff]  ;;  %v22_v1 = vld [vmem:[#allocation2 + $0x8] sm:$0xff] }
  0x13   :  { %s33_s19 = sshll.u32 %s93_s18, 4  ;;  %v23_v2 = vmax.f32 %v21_v0, 0.0  ;;  %v24_v3 = vmax.f32 %v22_v1, 0.0  ;;  %s34_s19 = int_to_ptr.vmem [resolvable:$true] %s33_s19 }
  0x14   :  { %s66_s20 = scalar_lea.vmem %s34_s19, 256  ;;  %p71_p9 = scmp.lt.s32.totalorder %s34_s19, %s34_s19 }
  0x15   :  { %25 = vst [vmem:[#allocation5] sm:$0xff] %v23_v2  ;;  %26 = vst [vmem:[#allocation5 + $0x8] sm:$0xff] %v24_v3  ;;  %p67_p8 = scmp.ne.s32.totalorder %s34_s19, %s66_s20  ;;  %p72_p10 = scmp.lt.s32.totalorder %s66_s20, %s66_s20 }
  0x17   :  { %p73_p11 = por %p72_p10, %p71_p9 }
  0x19   :  { %p74_p12 = pnand %p73_p11, %p67_p8 }
  0x1b   :  { %77 = shalt.err (!%p74_p12)
}
  0x1c   :  { %s78_s22 = scalar_lea.hbm %s129_s1, 256 }
  0x1d   :  { %p79_p13 = scmp.ne.s32.totalorder %s129_s1, %s78_s22  ;;  %p82_p0 = scmp.lt.u32.totalorder %s78_s22, %s129_s1 }
  0x1f   :  { %p84_p1 = pnand %p82_p0, %p79_p13 }
  0x21   :  { %87 = shalt.err (!%p84_p1)
}
  0x22   :  { %36 = dma.vmem_to_hbm [thread:$0]  %s34_s19, 256, %s129_s1, [#allocation4]  }
  0x23   :  { %90 = dma.done.wait [#allocation4], 256  }
  0x24   :  { %91 = vsyncadd [#allocation4], 4294967040 }
  0x25   :  { %40 = vsyncpa [#allocation3], 1 }
  0x26   :  { %41 = vsyncpa [#allocation4], 1 }

</bundles_post_ra>
